<compile_context>
chip_gen: v7x
topology: tpu7x:2x2x1
jax: 0.10.0
libtpu: 0.0.40
codegen_flags: <defaults>
</compile_context>

<pallas_src>
import jax
import jax.numpy as jnp
from jax.experimental import pallas as pl
from jax.experimental.pallas import tpu as pltpu


def _make_detection_kernel(anchors, stride, W, tile):
    A = len(anchors)
    stride = float(stride)
    anchors = [(float(aw), float(ah)) for (aw, ah) in anchors]
    w_is_pow2 = (W & (W - 1)) == 0
    shift = W.bit_length() - 1          # only used when w_is_pow2
    wf = float(W)
    inv_w = 1.0 / wf

    def kernel(x_ref, o_ref):
        # x_ref / o_ref: (A, C5, tile); batch dim squeezed by the BlockSpec.
        shape2 = (A, 2, tile)
        start = pl.program_id(1) * tile                      # global lane offset

        # --- grid-cell coordinates over the lane axis (built in-registers) ---
        col = jax.lax.broadcasted_iota(jnp.int32, shape2, 2) + start
        if w_is_pow2:
            gx = jnp.bitwise_and(col, W - 1).astype(jnp.float32)
            gy = jnp.right_shift(col, shift).astype(jnp.float32)
        else:
            # float reciprocal + floor (no vector integer div/mod), with a
            # one-step correction for FP rounding at row boundaries.
            colf = col.astype(jnp.float32)
            gy = jnp.floor(colf * inv_w)
            gx = colf - gy * wf
            low = gx < 0.0
            gy = jnp.where(low, gy - 1.0, gy)
            gx = jnp.where(low, gx + wf, gx)
            high = gx >= wf
            gy = jnp.where(high, gy + 1.0, gy)
            gx = jnp.where(high, gx - wf, gx)

        row = jax.lax.broadcasted_iota(jnp.int32, shape2, 1)  # 0 -> x/w, 1 -> y/h
        cell = jnp.where(row == 0, gx, gy)                    # (A, 2, tile)

        # --- anchor scales via iota + select (no dense constants, no loop of
        #     single-sublane stores) ---
        a_idx = jax.lax.broadcasted_iota(jnp.int32, shape2, 0)
        anc = jnp.zeros(shape2, jnp.float32)
        for a, (aw, ah) in enumerate(anchors):                # A is tiny & static
            anc = jnp.where(a_idx == a, jnp.where(row == 0, aw, ah), anc)

        # --- decode, per row group (no full-block upcast temporary) ---
        x01 = x_ref[:, 0:2, :].astype(jnp.float32)            # tx, ty
        x23 = x_ref[:, 2:4, :].astype(jnp.float32)            # tw, th
        x4 = x_ref[:, 4:, :].astype(jnp.float32)              # obj + classes

        o_ref[:, 0:2, :] = ((jax.nn.sigmoid(x01) + cell) * stride).astype(o_ref.dtype)
        # anchors are already in input-image pixels, so the stride cancels:
        #   exp(t) * (anchor/stride) * stride == exp(t) * anchor
        o_ref[:, 2:4, :] = (jnp.exp(x23) * anc).astype(o_ref.dtype)
        o_ref[:, 4:, :] = jax.nn.sigmoid(x4).astype(o_ref.dtype)

    return kernel


def detection_layer(x, anchors, img_dim, *, out_dtype=None, tile=None):
    """YOLOv3 detection decode.

    x: (B, A*(5+nc), H, W) NCHW feature map (any float dtype).
    anchors: list of (w, h) in input-image pixels (compile-time constants).
    Returns lane-dense predictions of shape (B, A, 5+nc, H*W).
    """
    B, C, H, W = x.shape
    A = len(anchors)
    C5 = C // A
    HW = H * W
    stride = img_dim / H  # TODO(synk): assumes a square feature map (H == W).
    out_dtype = x.dtype if out_dtype is None else out_dtype

    # Free reshape (contiguous split of the channel dim), no data movement.
    x_r = x.reshape(B, A, C5, HW)

    # Lane tile: multiple of 128, capped at 1024; no wrapper-side padding —
    # Pallas masks the ragged boundary block.
    if tile is None:
        tile = min(1024, ((HW + 127) // 128) * 128)
    n_t = pl.cdiv(HW, tile)

    n_elems = B * A * C5 * HW
    cost = pl.CostEstimate(
        flops=4 * n_elems,
        transcendentals=n_elems,
        bytes_accessed=n_elems * (jnp.dtype(x.dtype).itemsize
                                  + jnp.dtype(out_dtype).itemsize),
    )

    out = pl.pallas_call(
        _make_detection_kernel(anchors, stride, W, tile),
        out_shape=jax.ShapeDtypeStruct((B, A, C5, HW), out_dtype),
        grid=(B, n_t),
        in_specs=[pl.BlockSpec((None, A, C5, tile), lambda b, t: (b, 0, 0, t))],
        out_specs=pl.BlockSpec((None, A, C5, tile), lambda b, t: (b, 0, 0, t)),
        compiler_params=pltpu.CompilerParams(
            dimension_semantics=("parallel", "parallel")),
        cost_estimate=cost,
    )(x_r)

    # Lane-dense layout; downstream can reshape/transpose to (B, A*HW, 5+nc)
    # once, if needed, instead of paying an extra HBM pass here.
    return out


def detection_ref(x, anchors, img_dim):
    """Pure-JAX reference for the same decode, same (B, A, C5, HW) layout."""
    B, C, H, W = x.shape
    A = len(anchors)
    C5 = C // A
    HW = H * W
    stride = img_dim / H
    p = x.astype(jnp.float32).reshape(B, A, C5, HW)
    sig = jax.nn.sigmoid(p)
    cx = jnp.tile(jnp.arange(W, dtype=jnp.float32), H)
    cy = jnp.repeat(jnp.arange(H, dtype=jnp.float32), W)
    anc = jnp.asarray(anchors, jnp.float32)                     # (A, 2), pixels
    bx = (sig[:, :, 0, :] + cx) * stride
    by = (sig[:, :, 1, :] + cy) * stride
    bw = jnp.exp(p[:, :, 2, :]) * anc[:, 0][None, :, None]
    bh = jnp.exp(p[:, :, 3, :]) * anc[:, 1][None, :, None]
    rest = sig[:, :, 4:, :]
    return jnp.concatenate(
        [bx[:, :, None, :], by[:, :, None, :],
         bw[:, :, None, :], bh[:, :, None, :], rest], axis=2)   # (B, A, C5, HW)


if __name__ == "__main__":
    # 3 anchors, 3 classes -> C = 3*(5+3) = 24.
    anchors = [(10.0, 13.0), (16.0, 30.0), (33.0, 23.0)]
    key = jax.random.PRNGKey(0)
    k1, k2 = jax.random.split(key)

    # Case 1: power-of-2 feature map (16x16) -> exact lane tiling, bit-op path.
    B, C, H, W = 2, 24, 16, 16
    img_dim = 64                     # stride = 4
    x1 = jax.random.normal(k1, (B, C, H, W), dtype=jnp.float32)
    out1 = jax.block_until_ready(detection_layer(x1, anchors, img_dim))
    ref1 = detection_ref(x1, anchors, img_dim)
    assert out1.shape == (B, len(anchors), C // len(anchors), H * W)
    assert jnp.allclose(out1, ref1, rtol=1e-4, atol=1e-4)

    # Case 2: real YOLO head size (13x13) -> non-power-of-2 W and a ragged
    # lane tail handled by Pallas boundary masking (no pad / no slice).
    B2, C2, H2, W2 = 2, 24, 13, 13
    img_dim2 = 416                   # stride = 32
    x2 = jax.random.normal(k2, (B2, C2, H2, W2), dtype=jnp.float32)
    out2 = jax.block_until_ready(detection_layer(x2, anchors, img_dim2))
    ref2 = detection_ref(x2, anchors, img_dim2)
    assert out2.shape == (B2, len(anchors), C2 // len(anchors), H2 * W2)
    assert jnp.allclose(out2, ref2, rtol=1e-4, atol=1e-4)

    print("KERNEL_OK")
</pallas_src>

<mosaic_0001>
module attributes {stable_mosaic.version = 11 : i64} {
  func.func @kernel(%arg0: i32, %arg1: i32, %arg2: memref<1x3x8x256xf32, #tpu.memory_space<vmem>>, %arg3: memref<1x3x8x256xf32, #tpu.memory_space<vmem>>) attributes {dimension_semantics = [#tpu.dimension_semantics<parallel>, #tpu.dimension_semantics<parallel>], iteration_bounds = array<i64: 2, 1>, scalar_prefetch = 0 : i64, scratch_operands = 0 : i64, tpu.core_type = #tpu.core_type<tc>, window_params = [{transform_indices = @transform_0, window_bounds = array<i64: 1, 3, 8, 256>}, {transform_indices = @transform_1, window_bounds = array<i64: 1, 3, 8, 256>}]} {
    %c256_i32 = arith.constant 256 : i32
    %0 = arith.muli %arg1, %c256_i32 : i32
    %1 = tpu.iota {dimensions = array<i32: 2>} : vector<3x2x256xi32>
    %2 = vector.broadcast %0 : i32 to vector<3x2x256xi32>
    %3 = arith.addi %1, %2 : vector<3x2x256xi32>
    %c15_i32 = arith.constant 15 : i32
    %4 = vector.broadcast %c15_i32 : i32 to vector<3x2x256xi32>
    %5 = arith.andi %3, %4 : vector<3x2x256xi32>
    %6 = arith.sitofp %5 : vector<3x2x256xi32> to vector<3x2x256xf32>
    %c4_i32 = arith.constant 4 : i32
    %7 = vector.broadcast %c4_i32 : i32 to vector<3x2x256xi32>
    %8 = arith.shrsi %3, %7 : vector<3x2x256xi32>
    %9 = arith.sitofp %8 : vector<3x2x256xi32> to vector<3x2x256xf32>
    %10 = tpu.iota {dimensions = array<i32: 1>} : vector<3x2x256xi32>
    %c0_i32 = arith.constant 0 : i32
    %11 = vector.broadcast %c0_i32 : i32 to vector<3x2x256xi32>
    %12 = arith.cmpi eq, %10, %11 : vector<3x2x256xi32>
    %13 = arith.select %12, %6, %9 : vector<3x2x256xi1>, vector<3x2x256xf32>
    %14 = tpu.iota {dimensions = array<i32: 0>} : vector<3x2x256xi32>
    %cst = arith.constant 0.000000e+00 : f32
    %15 = vector.broadcast %cst : f32 to vector<3x2x256xf32>
    %c0_i32_0 = arith.constant 0 : i32
    %16 = vector.broadcast %c0_i32_0 : i32 to vector<3x2x256xi32>
    %17 = arith.cmpi eq, %14, %16 : vector<3x2x256xi32>
    %c0_i32_1 = arith.constant 0 : i32
    %18 = vector.broadcast %c0_i32_1 : i32 to vector<3x2x256xi32>
    %19 = arith.cmpi eq, %10, %18 : vector<3x2x256xi32>
    %cst_2 = arith.constant 1.000000e+01 : f32
    %cst_3 = arith.constant 1.300000e+01 : f32
    %20 = vector.broadcast %cst_2 : f32 to vector<3x2x256xf32>
    %21 = vector.broadcast %cst_3 : f32 to vector<3x2x256xf32>
    %22 = arith.select %19, %20, %21 : vector<3x2x256xi1>, vector<3x2x256xf32>
    %23 = arith.select %17, %22, %15 : vector<3x2x256xi1>, vector<3x2x256xf32>
    %c1_i32 = arith.constant 1 : i32
    %24 = vector.broadcast %c1_i32 : i32 to vector<3x2x256xi32>
    %25 = arith.cmpi eq, %14, %24 : vector<3x2x256xi32>
    %c0_i32_4 = arith.constant 0 : i32
    %26 = vector.broadcast %c0_i32_4 : i32 to vector<3x2x256xi32>
    %27 = arith.cmpi eq, %10, %26 : vector<3x2x256xi32>
    %cst_5 = arith.constant 1.600000e+01 : f32
    %cst_6 = arith.constant 3.000000e+01 : f32
    %28 = vector.broadcast %cst_5 : f32 to vector<3x2x256xf32>
    %29 = vector.broadcast %cst_6 : f32 to vector<3x2x256xf32>
    %30 = arith.select %27, %28, %29 : vector<3x2x256xi1>, vector<3x2x256xf32>
    %31 = arith.select %25, %30, %23 : vector<3x2x256xi1>, vector<3x2x256xf32>
    %c2_i32 = arith.constant 2 : i32
    %32 = vector.broadcast %c2_i32 : i32 to vector<3x2x256xi32>
    %33 = arith.cmpi eq, %14, %32 : vector<3x2x256xi32>
    %c0_i32_7 = arith.constant 0 : i32
    %34 = vector.broadcast %c0_i32_7 : i32 to vector<3x2x256xi32>
    %35 = arith.cmpi eq, %10, %34 : vector<3x2x256xi32>
    %cst_8 = arith.constant 3.300000e+01 : f32
    %cst_9 = arith.constant 2.300000e+01 : f32
    %36 = vector.broadcast %cst_8 : f32 to vector<3x2x256xf32>
    %37 = vector.broadcast %cst_9 : f32 to vector<3x2x256xf32>
    %38 = arith.select %35, %36, %37 : vector<3x2x256xi1>, vector<3x2x256xf32>
    %39 = arith.select %33, %38, %31 : vector<3x2x256xi1>, vector<3x2x256xf32>
    %c0 = arith.constant 0 : index
    %c0_10 = arith.constant 0 : index
    %c0_11 = arith.constant 0 : index
    %c0_12 = arith.constant 0 : index
    %40 = vector.load %arg2[%c0, %c0_10, %c0_11, %c0_12] : memref<1x3x8x256xf32, #tpu.memory_space<vmem>>, vector<1x3x2x256xf32>
    %41 = vector.shape_cast %40 : vector<1x3x2x256xf32> to vector<3x2x256xf32>
    %c0_13 = arith.constant 0 : index
    %c0_14 = arith.constant 0 : index
    %c2 = arith.constant 2 : index
    %c0_15 = arith.constant 0 : index
    %42 = vector.load %arg2[%c0_13, %c0_14, %c2, %c0_15] : memref<1x3x8x256xf32, #tpu.memory_space<vmem>>, vector<1x3x2x256xf32>
    %43 = vector.shape_cast %42 : vector<1x3x2x256xf32> to vector<3x2x256xf32>
    %c0_16 = arith.constant 0 : index
    %c0_17 = arith.constant 0 : index
    %c4 = arith.constant 4 : index
    %c0_18 = arith.constant 0 : index
    %44 = vector.load %arg2[%c0_16, %c0_17, %c4, %c0_18] : memref<1x3x8x256xf32, #tpu.memory_space<vmem>>, vector<1x3x4x256xf32>
    %45 = vector.shape_cast %44 : vector<1x3x4x256xf32> to vector<3x4x256xf32>
    %46 = arith.negf %41 : vector<3x2x256xf32>
    %47 = math.exp %46 : vector<3x2x256xf32>
    %cst_19 = arith.constant 1.000000e+00 : f32
    %48 = vector.broadcast %cst_19 : f32 to vector<3x2x256xf32>
    %49 = arith.addf %48, %47 : vector<3x2x256xf32>
    %50 = arith.divf %48, %49 : vector<3x2x256xf32>
    %51 = arith.addf %50, %13 : vector<3x2x256xf32>
    %cst_20 = arith.constant 4.000000e+00 : f32
    %52 = vector.broadcast %cst_20 : f32 to vector<3x2x256xf32>
    %53 = arith.mulf %51, %52 : vector<3x2x256xf32>
    %c0_21 = arith.constant 0 : index
    %c0_22 = arith.constant 0 : index
    %c0_23 = arith.constant 0 : index
    %c0_24 = arith.constant 0 : index
    %54 = vector.load %arg3[%c0_21, %c0_22, %c0_23, %c0_24] : memref<1x3x8x256xf32, #tpu.memory_space<vmem>>, vector<1x3x2x256xf32>
    %55 = vector.shape_cast %54 : vector<1x3x2x256xf32> to vector<3x2x256xf32>
    %56 = vector.shape_cast %53 : vector<3x2x256xf32> to vector<1x3x2x256xf32>
    tpu.vector_store %arg3[%c0_21, %c0_22, %c0_23, %c0_24], %56 {strides = array<i32>} : memref<1x3x8x256xf32, #tpu.memory_space<vmem>>, vector<1x3x2x256xf32>,
    %57 = math.exp %43 : vector<3x2x256xf32>
    %58 = arith.mulf %57, %39 : vector<3x2x256xf32>
    %c0_25 = arith.constant 0 : index
    %c0_26 = arith.constant 0 : index
    %c2_27 = arith.constant 2 : index
    %c0_28 = arith.constant 0 : index
    %59 = vector.load %arg3[%c0_25, %c0_26, %c2_27, %c0_28] : memref<1x3x8x256xf32, #tpu.memory_space<vmem>>, vector<1x3x2x256xf32>
    %60 = vector.shape_cast %59 : vector<1x3x2x256xf32> to vector<3x2x256xf32>
    %61 = vector.shape_cast %58 : vector<3x2x256xf32> to vector<1x3x2x256xf32>
    tpu.vector_store %arg3[%c0_25, %c0_26, %c2_27, %c0_28], %61 {strides = array<i32>} : memref<1x3x8x256xf32, #tpu.memory_space<vmem>>, vector<1x3x2x256xf32>,
    %62 = arith.negf %45 : vector<3x4x256xf32>
    %63 = math.exp %62 : vector<3x4x256xf32>
    %cst_29 = arith.constant 1.000000e+00 : f32
    %64 = vector.broadcast %cst_29 : f32 to vector<3x4x256xf32>
    %65 = arith.addf %64, %63 : vector<3x4x256xf32>
    %66 = arith.divf %64, %65 : vector<3x4x256xf32>
    %c0_30 = arith.constant 0 : index
    %c0_31 = arith.constant 0 : index
    %c4_32 = arith.constant 4 : index
    %c0_33 = arith.constant 0 : index
    %67 = vector.load %arg3[%c0_30, %c0_31, %c4_32, %c0_33] : memref<1x3x8x256xf32, #tpu.memory_space<vmem>>, vector<1x3x4x256xf32>
    %68 = vector.shape_cast %67 : vector<1x3x4x256xf32> to vector<3x4x256xf32>
    %69 = vector.shape_cast %66 : vector<3x4x256xf32> to vector<1x3x4x256xf32>
    tpu.vector_store %arg3[%c0_30, %c0_31, %c4_32, %c0_33], %69 {strides = array<i32>} : memref<1x3x8x256xf32, #tpu.memory_space<vmem>>, vector<1x3x4x256xf32>,
    return
  }
  func.func @transform_0(%arg0: i32, %arg1: i32) -> (i32, i32, i32, i32) {
    %c0_i32 = arith.constant 0 : i32
    %c0_i32_0 = arith.constant 0 : i32
    %c0_i32_1 = arith.constant 0 : i32
    return %arg0, %c0_i32, %c0_i32_0, %arg1 : i32, i32, i32, i32
  }
  func.func @transform_1(%arg0: i32, %arg1: i32) -> (i32, i32, i32, i32) {
    %c0_i32 = arith.constant 0 : i32
    %c0_i32_0 = arith.constant 0 : i32
    %c0_i32_1 = arith.constant 0 : i32
    return %arg0, %c0_i32, %c0_i32_0, %arg1 : i32, i32, i32, i32
  }
}

</mosaic_0001>

<bundles_post_ra>
// kernel: tpu_custom_call.1
= control target key start
LH: loop header
LB: loop body
LE: loop exit
PB: predicated region body
PF: predicated region fallthrough
CT: control target
= control target key end

     0   :  { %6 = vsyncpa [#allocation3], 0  ;;  %s956_s0 = inlined_call_operand.hbm [shape: f32[2,3,8,256], index: 0, kind: input, shape index: {}]   ;;  %s957_s1 = inlined_call_operand.hbm [shape: f32[2,3,8,256], index: 1, kind: output, shape index: {}]  }
   0x1   :  { %8 = vsyncpa [#allocation3 + $0x1], 0 }
   0x2   :  { %9 = vsyncpa [#allocation4], 0 }
   0x3   :  { %11 = vsyncpa [#allocation4 + $0x1], 0  ;;  %s723_s6 = smov 0   ;;  %s725_s7 = smov 0  }
   0x4   :  { %s727_s8 = smov 0   ;;  %s729_s9 = smov 0  }
   0x5   :  { %s731_s10 = smov 0   ;;  %s733_s11 = smov 0  }
   0x6 LB: > { %s436_s12 = sadd.s32 4294967295, %s702_s11   ;;  %s437_s13 = sadd.s32 4294967294, %s702_s11   ;;  %s702_s11 = sphi %s733_s11, %s17_s11   ;;  %s698_s10 = sphi %s731_s10, %s972_s10   ;;  %s694_s9 = sphi %s729_s9, %s971_s9   ;;  %s690_s8 = sphi %s727_s8, %s970_s8   ;;  %s686_s7 = sphi %s725_s7, %s969_s7   ;;  %s682_s6 = sphi %s723_s6, %s968_s6  }
   0x7   : > { %s29_s14 = sadd.s32 1, %s698_s10  ;;  %s38_s15 = sadd.s32 1, %s690_s8 }
   0x8   : > { %p31_p0 = scmp.ge.s32.totalorder %s29_s14, 2  ;;  %p45_p1 = scmp.ne.s32.totalorder %s690_s8, %s686_s7 }
   0x9   : > { %p46_p2 = scmp.eq.s32.totalorder %s702_s11, 0  ;;  %p51_p3 = scmp.ne.s32.totalorder %s686_s7, %s682_s6 }
   0xa   : > { %s974_s14 = smov (%p31_p0, %s29_s14), 0  ;;  %p52_p5 = scmp.eq.s32.totalorder %s436_s12, 0 }
   0xb   : > { %p764_p4 = por %p46_p2, %p45_p1  ;;  %s33_s17 = ssub.s32 %s698_s10, %s974_s14 }
   0xc   : > { %p77_p6 = scmp.eq.s32.totalorder %s436_s12, 1  ;;  %p36_p7 = scmp.eq.s32.totalorder %s33_s17, 0 }
   0xd   : > { %p770_p8 = por %p52_p5, %p51_p3  ;;  %p83_p10 = scmp.eq.s32.totalorder %s437_s13, 1 }
   0xe   : > { %p774_p9 = por %p77_p6, %p45_p1  ;;  %p473_p13 = scmp.lt.s32.totalorder %s702_s11, 2 }
   0xf   : > { %s779_s20 = scalar_select %p36_p7, %s690_s8, %s38_s15  }
  0x10   : > { %s961_s19 = scalar_select %p774_p9, 1, 0 }
  0x11   : > { %p781_p11 = por %p83_p10, %p51_p3  ;;  %s103_s22 = sand.u32 1, %s690_s8  }
  0x12   : > { %s457_s23 = smul.u32 48, %s103_s22  ;;  %p791_p0 = pnand %p473_p13, %p764_p4 }
  0x13   : > { %s962_s21 = scalar_select %p781_p11, 1, 0 }
  0x14   : > { %s458_s24 = smul.u32 768, %s698_s10  ;;  %s107_s29 = scalar_lea.vmem [#allocation2], %s457_s23 }
  0x15   : > { %s116_s30 = sshll.u32 %s107_s29, 4  ;;  %s803_s2 = scalar_lea.sflag [#allocation3], %s103_s22  ;;  %s800_s30 = int_to_ptr.vmem [resolvable:$true] %s116_s30 }
  0x16   : > { %s798_s28 = scalar_lea.hbm %s956_s0, %s458_s24  ;;  %p592_p3 = pneg %p791_p0 }
  0x17   : > { %s590_s3 = scalar_lea.hbm %s798_s28, 768  ;;  %s595_s12 = scalar_lea.hbm %s956_s0, 1536 }
  0x18   : > { %p591_p2 = scmp.ne.s32.totalorder %s798_s28, %s590_s3  ;;  %p596_p6 = scmp.lt.u32.totalorder %s798_s28, %s956_s0 }
  0x19   : > { %p597_p7 = scmp.lt.u32.totalorder %s595_s12, %s590_s3  ;;  %p599_p13 = scmp.lt.u32.totalorder %s590_s3, %s798_s28 }
  0x1a   : > { %p593_p4 = pnand %p592_p3, %p591_p2 }
  0x1b   : > { %p598_p10 = por %p597_p7, %p596_p6 }
  0x1c   : > { %p594_p5 = pneg %p593_p4 }
  0x1d   : > { %p600_p12 = por %p599_p13, %p598_p10 }
  0x1f   : > { %p601_p1 = pnand %p600_p12, %p594_p5 }
  0x21   : > { %604 = shalt.err (!%p601_p1)
}
  0x22   : > { %s605_s16 = scalar_lea.vmem %s800_s30, 768  ;;  %s704_s17 = smov [#allocation2]  }
  0x23   : > { %p606_p2 = scmp.ne.s32.totalorder %s800_s30, %s605_s16  ;;  %s610_s22 = sshll.u32 %s704_s17, 4  ;;  %s611_s22 = int_to_ptr.vmem [resolvable:$false] %s610_s22 }
  0x24   : > { %s612_s23 = scalar_lea.vmem %s611_s22, 1536  ;;  %p613_p9 = scmp.lt.s32.totalorder %s800_s30, %s611_s22 }
  0x25   : > { %p608_p4 = pnand %p606_p2, %p592_p3  ;;  %p614_p6 = scmp.lt.s32.totalorder %s612_s23, %s605_s16 }
  0x27   : > { %p609_p11 = pneg %p608_p4  ;;  %p615_p7 = por %p614_p6, %p613_p9 }
  0x29   : > { %p616_p10 = pnand %p615_p7, %p609_p11 }
  0x2b   : > { %619 = shalt.err (!%p616_p10)
}
  0x2c   : > { %s705_s24 = smov 256   ;;  %s706_s26 = smov 16  }
  0x2d   : > { %468 = dma.hbm_to_vmem [thread:$0]  (!%p791_p0), %s798_s28, 768, %s800_s30, %s803_s2, %s705_s24, %s705_s24, %s706_s26  }
  0x2e   : > { %p124_p12 = scmp.lt.s32.totalorder %s702_s11, 3  ;;  %p964_p1 = scmp.ge.s32.totalorder %s702_s11, 1 }
  0x30   : > { %p125_p3 = pnand %p964_p1, %p124_p12 }
  0x31   : > { %s835_s27 = sand.u32 (!%p125_p3), 1, %s686_s7  }
  0x32   : > { %128 = sbr.rel (%p125_p3) target bundleno = 123 (0x7b), region = 24  ;;  %s131_s3 = scalar_lea.sflag (!%p125_p3), [#allocation3], %s835_s27 }
  0x33   : > { %s459_s29 = smul.u32 (!%p125_p3), 48, %s835_s27 }
  0x35   : > { %s841_s4 = scalar_lea.vmem (!%p125_p3), [#allocation2], %s459_s29 }
  0x39   : > { %673 = dma.done.wait (%p770_p8), %s131_s3, 768  }
  0x3a   : > { %675 = vsyncadd (%p770_p8), %s131_s3, 4294966528  ;;  %v186_v0 = vld [vmem:[%s841_s4] sm:$0x3]  ;;  %v187_v1 = vld [vmem:[%s841_s4 + $0x8] sm:$0x3]  ;;  %v156_v6 = vlaneseq  ;;  %v707_v33 = vmov 13.0  }
  0x3b   : > { %v188_v2 = vld [vmem:[%s841_s4 + $0x10] sm:$0x3]  ;;  %v442_v3 = vmul.f32 -1.442695, %v186_v0  ;;  %v189_v4 = vld [vmem:[%s841_s4 + $0x18] sm:$0x3] }
  0x3c   : > { %v190_v5 = vld [vmem:[%s841_s4 + $0x20] sm:$0x3]  ;;  %v443_v7 = vmul.f32 -1.442695, %v187_v1  ;;  %v444_v8 = vmul.f32 -1.442695, %v188_v2 }
  0x3d   : > { %v445_v9 = vmul.f32 -1.442695, %v189_v4  ;;  %530 = vpow2.f32 %v442_v3  ;;  %v446_v10 = vmul.f32 -1.442695, %v190_v5  ;;  %v191_v11 = vld [vmem:[%s841_s4 + $0x28] sm:$0x3] }
  0x3e   : > { %v192_v12 = vld [vmem:[%s841_s4] sm:$0xc]  ;;  %532 = vpow2.f32 %v443_v7  ;;  %v447_v13 = vmul.f32 -1.442695, %v191_v11  ;;  %v193_v15 = vld [vmem:[%s841_s4 + $0x8] sm:$0xc] }
  0x3f   : > { %534 = vpow2.f32 %v444_v8  ;;  %v258_v14 = vmul.f32 1.442695, %v192_v12  ;;  %v194_v16 = vld [vmem:[%s841_s4 + $0x10] sm:$0xc]  ;;  %v157_v17 = vand.u32 127, %v156_v6  ;;  %v856_v18 = vshrl.u32 %v156_v6, 7 }
  0x40   : > { %536 = vpow2.f32 %v445_v9  ;;  %v260_v19 = vmul.f32 1.442695, %v193_v15  ;;  %v195_v20 = vld [vmem:[%s841_s4 + $0x18] sm:$0xc]  ;;  %v262_v21 = vmul.f32 1.442695, %v194_v16 }
  0x41   : > { %538 = vpow2.f32 %v446_v10  ;;  %v196_v22 = vld [vmem:[%s841_s4 + $0x20] sm:$0xc]  ;;  %v197_v23 = vld [vmem:[%s841_s4 + $0x28] sm:$0xc]  ;;  %v264_v24 = vmul.f32 1.442695, %v195_v20 }
  0x42   : > { %540 = vpow2.f32 %v447_v13  ;;  %v198_v25 = vld [vmem:[%s841_s4] sm:$0xf0]  ;;  %v266_v26 = vmul.f32 1.442695, %v196_v22  ;;  %vm172_vm0 = vcmp.eq.s32.totalorder %v856_v18, 0  ;;  %v158_v28 = vadd.s32 128, %v157_v17 }
  0x43   : > { %542 = vpow2.f32 %v258_v14  ;;  %v268_v27 = vmul.f32 1.442695, %v197_v23  ;;  %v448_v29 = vmul.f32 -1.442695, %v198_v25  ;;  %v162_v30 = vand.u32 15, %v157_v17  ;;  %s876_s18 = scalar_lea.vmem [#allocation5], %s459_s29 }
  0x44   : > { %544 = vpow2.f32 %v260_v19  ;;  %v166_v32 = vshra.s32 %v157_v17, 4  ;;  %v175_v34 = vsel %vm172_vm0, 10.0, %v707_v33  ;;  %v708_v37 = vmov 30.0   ;;  %v199_v44 = vld [vmem:[%s841_s4 + $0x8] sm:$0xf0]  ;;  %s460_s25 = smul.u32 768, %s694_s9 }
  0x45   : > { %546 = vpow2.f32 %v262_v21  ;;  %v178_v38 = vsel %vm172_vm0, 16.0, %v708_v37  ;;  %v163_v40 = vand.u32 15, %v158_v28  ;;  %v709_v42 = vmov 23.0   ;;  %v200_v49 = vld [vmem:[%s841_s4 + $0x10] sm:$0xf0]  ;;  %s349_s28 = sshll.u32 %s876_s18, 4  ;;  %s899_s28 = int_to_ptr.vmem [resolvable:$true] %s349_s28 }
  0x46   : > { %548 = vpow2.f32 %v264_v24  ;;  %v182_v43 = vsel %vm172_vm0, 33.0, %v709_v42  ;;  %v164_v46 = vcvt.s32.f32 %v162_v30  ;;  %v273_v48 = vrot.slane %v175_v34, 6  ;;  %v201_v54 = vld [vmem:[%s841_s4 + $0x18] sm:$0xf0]  ;;  %v202_v59 = vld [vmem:[%s841_s4 + $0x20] sm:$0xf0]  ;;  %s905_s5 = scalar_lea.hbm %s957_s1, %s460_s25 }
  0x47   : > { %v531_v31 = vpop.eup %530  ;;  %550 = vpow2.f32 %v266_v26  ;;  %v168_v51 = vcvt.s32.f32 %v166_v32  ;;  %v167_v52 = vshra.s32 %v158_v28, 4  ;;  %v274_v57 = vrot.slane %v178_v38, 6  ;;  %v203_v0 = vld [vmem:[%s841_s4 + $0x28] sm:$0xf0]  ;;  %s334_s9 = scalar_lea.sflag [#allocation4], %s835_s27  ;;  %s620_s12 = scalar_lea.vmem %s899_s28, 768 }
  0x48   : > { %v533_v35 = vpop.eup %532  ;;  %v222_v36 = vadd.f32 1.0, %v531_v31  ;;  %552 = vpow2.f32 %v268_v27  ;;  %v449_v58 = vmul.f32 -1.442695, %v199_v44  ;;  %v165_v61 = vcvt.s32.f32 %v163_v40  ;;  %p621_p8 = scmp.ne.s32.totalorder %s899_s28, %s620_s12  ;;  %p965_p9 = scmp.ne.s32.totalorder %s961_s19, 0 }
  0x49   : > { %v535_v39 = vpop.eup %534  ;;  %v223_v41 = vadd.f32 1.0, %v533_v35  ;;  %554 = vpow2.f32 %v448_v29  ;;  %v450_v63 = vmul.f32 -1.442695, %v200_v49  ;;  %v275_v3 = vrot.slane %v182_v43, 6  ;;  %s710_s13 = smov [#allocation5]  }
  0x4a   : > { %v537_v45 = vpop.eup %536  ;;  %556 = vrcp.f32 %v222_v36  ;;  %v224_v47 = vadd.f32 1.0, %v535_v39  ;;  %v451_v4 = vmul.f32 -1.442695, %v201_v54  ;;  %v169_v6 = vcvt.s32.f32 %v167_v52  ;;  %p622_p11 = pnand %p621_p8, %p965_p9  ;;  %s624_s15 = sshll.u32 %s710_s13, 4  ;;  %s625_s15 = int_to_ptr.vmem [resolvable:$false] %s624_s15 }
  0x4b   : > { %v539_v50 = vpop.eup %538  ;;  %558 = vrcp.f32 %v223_v41  ;;  %v225_v53 = vadd.f32 1.0, %v537_v45  ;;  %v452_v8 = vmul.f32 -1.442695, %v202_v59  ;;  %v453_v11 = vmul.f32 -1.442695, %v203_v0  ;;  %s626_s16 = scalar_lea.vmem %s625_s15, 1536  ;;  %p627_p5 = scmp.lt.s32.totalorder %s899_s28, %s625_s15 }
  0x4c   : > { %v541_v55 = vpop.eup %540  ;;  %560 = vrcp.f32 %v224_v47  ;;  %v226_v56 = vadd.f32 1.0, %v539_v50  ;;  %v173_v15 = vsel %vm172_vm0, %v164_v46, %v168_v51  ;;  %v174_v19 = vsel %vm172_vm0, %v165_v61, %v169_v6  ;;  %p623_p0 = pneg %p622_p11  ;;  %p628_p13 = scmp.lt.s32.totalorder %s626_s16, %s620_s12 }
  0x4d   : > { %v543_v60 = vpop.eup %542  ;;  %562 = vrcp.f32 %v225_v53  ;;  %v227_v62 = vadd.f32 1.0, %v541_v55 }
  0x4e   : > { %v545_v1 = vpop.eup %544  ;;  %564 = vrcp.f32 %v226_v56  ;;  %v279_v2 = vmul.f32 %v543_v60, %v273_v48  ;;  %p629_p2 = por %p628_p13, %p627_p5 }
  0x4f   : > { %v547_v5 = vpop.eup %546  ;;  %566 = vrcp.f32 %v227_v62  ;;  %v280_v7 = vmul.f32 %v545_v1, %v273_v48 }
  0x50   : > { %v549_v9 = vpop.eup %548  ;;  %285 = vst [vmem:[%s876_s18] sm:$0xc] %v279_v2  ;;  %v281_v10 = vmul.f32 %v547_v5, %v274_v57  ;;  %568 = vpow2.f32 %v449_v58  ;;  %p630_p4 = pnand %p629_p2, %p623_p0 }
  0x51   : > { %v551_v12 = vpop.eup %550  ;;  %286 = vst [vmem:[%s876_s18 + $0x8] sm:$0xc] %v280_v7  ;;  %v282_v13 = vmul.f32 %v549_v9, %v274_v57  ;;  %570 = vpow2.f32 %v450_v63 }
  0x52   : > { %v553_v14 = vpop.eup %552  ;;  %287 = vst [vmem:[%s876_s18 + $0x10] sm:$0xc] %v281_v10  ;;  %v283_v16 = vmul.f32 %v551_v12, %v275_v3  ;;  %572 = vpow2.f32 %v451_v4 }
  0x53   : > { %v555_v17 = vpop.eup %554  ;;  %288 = vst [vmem:[%s876_s18 + $0x18] sm:$0xc] %v282_v13  ;;  %v284_v20 = vmul.f32 %v553_v14, %v275_v3  ;;  %574 = vpow2.f32 %v452_v8 }
  0x54   : > { %v557_v21 = vpop.eup %556  ;;  %289 = vst [vmem:[%s876_s18 + $0x20] sm:$0xc] %v283_v16  ;;  %v309_v22 = vadd.f32 1.0, %v555_v17  ;;  %576 = vpow2.f32 %v453_v11 }
  0x55   : > { %v559_v23 = vpop.eup %558  ;;  %v240_v24 = vadd.f32 %v557_v21, %v173_v15  ;;  %290 = vst [vmem:[%s876_s18 + $0x28] sm:$0xc] %v284_v20 }
  0x56   : > { %v561_v25 = vpop.eup %560  ;;  %v241_v26 = vadd.f32 %v559_v23, %v174_v19  ;;  %578 = vrcp.f32 %v309_v22 }
  0x57   : > { %v563_v27 = vpop.eup %562  ;;  %v246_v28 = vmul.f32 4.0, %v240_v24  ;;  %v242_v18 = vadd.f32 %v561_v25, %v173_v15 }
  0x58   : > { %v565_v29 = vpop.eup %564  ;;  %v247_v30 = vmul.f32 4.0, %v241_v26  ;;  %v243_v31 = vadd.f32 %v563_v27, %v174_v19 }
  0x59   : > { %v567_v32 = vpop.eup %566  ;;  %252 = vst [vmem:[%s876_s18] sm:$0x3] %v246_v28  ;;  %v248_v33 = vmul.f32 4.0, %v242_v18  ;;  %v244_v34 = vadd.f32 %v565_v29, %v173_v15 }
  0x5a   : > { %v569_v35 = vpop.eup %568  ;;  %253 = vst [vmem:[%s876_s18 + $0x8] sm:$0x3] %v247_v30  ;;  %v249_v36 = vmul.f32 4.0, %v243_v31  ;;  %v245_v37 = vadd.f32 %v567_v32, %v174_v19 }
  0x5b   : > { %v571_v38 = vpop.eup %570  ;;  %254 = vst [vmem:[%s876_s18 + $0x10] sm:$0x3] %v248_v33  ;;  %v250_v39 = vmul.f32 4.0, %v244_v34  ;;  %v310_v40 = vadd.f32 1.0, %v569_v35 }
  0x5c   : > { %v573_v41 = vpop.eup %572  ;;  %255 = vst [vmem:[%s876_s18 + $0x18] sm:$0x3] %v249_v36  ;;  %v251_v42 = vmul.f32 4.0, %v245_v37  ;;  %v311_v43 = vadd.f32 1.0, %v571_v38 }
  0x5d   : > { %v575_v44 = vpop.eup %574  ;;  %256 = vst [vmem:[%s876_s18 + $0x20] sm:$0x3] %v250_v39  ;;  %580 = vrcp.f32 %v310_v40  ;;  %v312_v45 = vadd.f32 1.0, %v573_v41 }
  0x5e   : > { %v577_v46 = vpop.eup %576  ;;  %257 = vst [vmem:[%s876_s18 + $0x28] sm:$0x3] %v251_v42  ;;  %582 = vrcp.f32 %v311_v43  ;;  %v313_v47 = vadd.f32 1.0, %v575_v44 }
  0x5f   : > { %584 = vrcp.f32 %v312_v45  ;;  %v314_v48 = vadd.f32 1.0, %v577_v46 }
  0x60   : > { %v579_v49 = vpop.eup %578  ;;  %586 = vrcp.f32 %v313_v47 }
  0x61   : > { %327 = vst [vmem:[%s876_s18] sm:$0xf0] %v579_v49  ;;  %588 = vrcp.f32 %v314_v48 }
  0x67   : > { %v581_v50 = vpop.eup %580 }
  0x68   : > { %v583_v51 = vpop.eup %582  ;;  %328 = vst [vmem:[%s876_s18 + $0x8] sm:$0xf0] %v581_v50 }
  0x69   : > { %v585_v52 = vpop.eup %584  ;;  %329 = vst [vmem:[%s876_s18 + $0x10] sm:$0xf0] %v583_v51 }
  0x6a   : > { %v587_v53 = vpop.eup %586  ;;  %330 = vst [vmem:[%s876_s18 + $0x18] sm:$0xf0] %v585_v52 }
  0x6b   : > { %v589_v54 = vpop.eup %588  ;;  %331 = vst [vmem:[%s876_s18 + $0x20] sm:$0xf0] %v587_v53 }
  0x6c   : > { %332 = vst [vmem:[%s876_s18 + $0x28] sm:$0xf0] %v589_v54 }
  0x6d   : > { %633 = shalt.err (!%p630_p4)
}
  0x6e   : > { %s634_s17 = scalar_lea.hbm %s905_s5, 768  ;;  %s638_s24 = scalar_lea.hbm %s957_s1, 1536 }
  0x6f   : > { %p635_p6 = scmp.ne.s32.totalorder %s905_s5, %s634_s17  ;;  %p639_p12 = scmp.lt.u32.totalorder %s905_s5, %s957_s1 }
  0x70   : > { %p640_p1 = scmp.lt.u32.totalorder %s638_s24, %s634_s17  ;;  %p642_p8 = scmp.lt.u32.totalorder %s634_s17, %s905_s5 }
  0x71   : > { %p636_p7 = pnand %p635_p6, %p965_p9 }
  0x72   : > { %p641_p3 = por %p640_p1, %p639_p12 }
  0x73   : > { %p637_p10 = pneg %p636_p7 }
  0x74   : > { %p643_p11 = por %p642_p8, %p641_p3 }
  0x76   : > { %p644_p0 = pnand %p643_p11, %p637_p10 }
  0x78   : > { %647 = shalt.err (!%p644_p0)
}
  0x79   : > { %s711_s3 = smov 256   ;;  %s712_s4 = smov 16  }
  0x7a   : > { %463 = dma.vmem_to_hbm [thread:$0]  (%p965_p9), %s899_s28, 768, %s905_s5, %s334_s9, %s711_s3, %s711_s3, %s712_s4  }
  0x7b PF: > { %s364_s18 = sand.u32 1, %s682_s6   ;;  %p966_p5 = scmp.ne.s32.totalorder %s962_s21, 0 }
  0x7c   : > { %p967_p13 = scmp.ge.s32.totalorder %s702_s11, 2  ;;  %s365_s25 = scalar_lea.sflag [#allocation4], %s364_s18 }
  0x7e   : > { %p470_p2 = pnand %p967_p13, %p966_p5 }
  0x80   : > { %677 = dma.done.wait (!%p470_p2), %s365_s25, 768  }
  0x81   : > { %679 = vsyncadd (!%p470_p2), %s365_s25, 4294966528  ;;  %s17_s11 = sadd.s32 1, %s702_s11   ;;  %s968_s6 = smov %s686_s7 }
  0x82   : > { %p14_p4 = scmp.ge.s32.totalorder %s17_s11, 4   ;;  %s969_s7 = smov %s690_s8 }
  0x83   : > { %s970_s8 = smov %s779_s20  ;;  %s971_s9 = smov %s698_s10 }
  0x84   : > { %s972_s10 = smov %s974_s14  ;;  %16 = sbr.rel (!%p14_p4) target bundleno = 6 (0x6), region = 69 }
  0x8b   :  { %370 = vsyncpa [#allocation3], 1 }
  0x8c   :  { %372 = vsyncpa [#allocation3 + $0x1], 1 }
  0x8d   :  { %373 = vsyncpa [#allocation4], 1 }
  0x8e   :  { %375 = vsyncpa [#allocation4 + $0x1], 1 }

</bundles_post_ra>
